<compile_context>
chip_gen: v5e
topology: v5e:2x2
jax: 0.10.0
libtpu: 0.0.40
codegen_flags: <defaults>
</compile_context>

<pallas_src>
import functools

import jax
import jax.numpy as jnp
from jax import lax
from jax.experimental import pallas as pl
from jax.experimental.pallas import tpu as pltpu


# --------------------------------------------------------------------------
# Pass 1: fused QKV projection (one (tm, C) @ (C, 3H) matmul per tile).
# --------------------------------------------------------------------------
def _qkv_proj_kernel(x_ref, w_ref, q_ref, k_ref, v_ref, *, head_size,
                     compute_dtype):
    x = x_ref[0].astype(compute_dtype)                       # (tm, C)
    w = w_ref[...].astype(compute_dtype)                     # (C, 3H)
    qkv = jnp.dot(x, w, preferred_element_type=jnp.float32)  # (tm, 3H), f32 acc

    # Fold the attention scale into Q here (T*H multiplies instead of T*T).
    scale = float(head_size) ** -0.5
    q_ref[0] = (qkv[:, :head_size] * scale).astype(q_ref.dtype)
    k_ref[0] = qkv[:, head_size:2 * head_size].astype(k_ref.dtype)
    v_ref[0] = qkv[:, 2 * head_size:].astype(v_ref.dtype)


# --------------------------------------------------------------------------
# Pass 2: causal flash attention with online softmax + causal block skipping.
# --------------------------------------------------------------------------
def _flash_attn_kernel(q_ref, k_ref, v_ref, o_ref, m_sc, l_sc, acc_sc, *,
                       block_q, block_kv):
    qi = pl.program_id(1)
    ki = pl.program_id(2)

    @pl.when(ki == 0)
    def _init():
        m_sc[...] = jnp.full_like(m_sc, -jnp.inf)
        l_sc[...] = jnp.zeros_like(l_sc)
        acc_sc[...] = jnp.zeros_like(acc_sc)

    def _scores():
        # q @ k^T via dot_general contracting last axes — no k.T materialized.
        return lax.dot_general(q_ref[0], k_ref[0], (((1,), (1,)), ((), ())),
                               preferred_element_type=jnp.float32)  # (tq, tk)

    def _update(s):
        m_prev = m_sc[...]                                     # (tq, 1)
        m_new = jnp.maximum(m_prev, s.max(axis=-1, keepdims=True))
        alpha = jnp.exp(m_prev - m_new)                        # (tq, 1)
        p = jnp.exp(s - m_new)                                 # (tq, tk)
        l_sc[...] = alpha * l_sc[...] + p.sum(axis=-1, keepdims=True)
        acc_sc[...] = alpha * acc_sc[...] + jnp.dot(
            p.astype(v_ref.dtype), v_ref[0],
            preferred_element_type=jnp.float32)
        m_sc[...] = m_new

    # Block fully below the causal diagonal: every score is valid -> no mask.
    below = (ki + 1) * block_kv - 1 <= qi * block_q
    # Block straddling the diagonal: causal mask required.
    diag = jnp.logical_and((ki + 1) * block_kv - 1 > qi * block_q,
                           ki * block_kv < (qi + 1) * block_q)
    # Blocks entirely above the diagonal satisfy neither predicate and are
    # skipped (their K/V DMA is also skipped via the clamped index_map below).

    @pl.when(below)
    def _below_diag():
        _update(_scores())

    @pl.when(diag)
    def _on_diag():
        s = _scores()
        # Causal mask in global coordinates.  The ki==0 block is always
        # processed, so every query row keeps at least one finite score and
        # the -inf masking is NaN-safe.
        row = lax.broadcasted_iota(jnp.int32, s.shape, 0) + qi * block_q
        col = lax.broadcasted_iota(jnp.int32, s.shape, 1) + ki * block_kv
        _update(jnp.where(col <= row, s, -jnp.inf))

    @pl.when(ki == pl.num_programs(2) - 1)
    def _finalize():
        # Normalize only the (tq, H) accumulator; reciprocal goes to the EUP.
        inv_l = pl.reciprocal(l_sc[...], approx=True)
        o_ref[0] = (acc_sc[...] * inv_l).astype(o_ref.dtype)


def _pick_tile(dim, cap):
    """Largest multiple of 8 that divides `dim` and is <= cap, else `dim`."""
    if dim <= cap:
        return dim
    for t in range(cap, 7, -1):
        if dim % t == 0 and t % 8 == 0:
            return t
    return dim  # whole dimension is always a legal block


def head_forward(x, wk, wq, wv, *, block_q=None, block_kv=None,
                 compute_dtype=None, vmem_limit_bytes=None):
    """Single causal self-attention head.

    x: (B, T, C); wk/wq/wv: (C, H) (transposed nn.Linear weights) -> (B, T, H)
    compute_dtype: MXU operand dtype (e.g. jnp.bfloat16); accumulation is f32.
    """
    B, T, C = x.shape
    H = wq.shape[1]
    assert wk.shape == (C, H) and wv.shape == (C, H)
    if compute_dtype is None:
        compute_dtype = x.dtype

    # Fused QKV weight: one (C, 3H) matmul instead of three under-filled ones.
    w_qkv = jnp.concatenate([wq, wk, wv], axis=1)              # q | k | v

    # ---------------- projection pass ----------------
    tm = _pick_tile(T, 512)
    proj = pl.pallas_call(
        functools.partial(_qkv_proj_kernel, head_size=H,
                          compute_dtype=compute_dtype),
        out_shape=(
            jax.ShapeDtypeStruct((B, T, H), compute_dtype),
            jax.ShapeDtypeStruct((B, T, H), compute_dtype),
            jax.ShapeDtypeStruct((B, T, H), compute_dtype),
        ),
        grid_spec=pltpu.PrefetchScalarGridSpec(
            num_scalar_prefetch=0,
            grid=(B, T // tm),
            in_specs=[
                pl.BlockSpec((1, tm, C), lambda b, i: (b, i, 0)),
                pl.BlockSpec((C, 3 * H), lambda b, i: (0, 0)),
            ],
            out_specs=[
                pl.BlockSpec((1, tm, H), lambda b, i: (b, i, 0)),
                pl.BlockSpec((1, tm, H), lambda b, i: (b, i, 0)),
                pl.BlockSpec((1, tm, H), lambda b, i: (b, i, 0)),
            ],
        ),
        compiler_params=pltpu.CompilerParams(
            dimension_semantics=("parallel", "parallel"),
            vmem_limit_bytes=vmem_limit_bytes),
    )
    q, k, v = proj(x, w_qkv)

    # ---------------- attention pass ----------------
    tq = block_q if block_q is not None else _pick_tile(T, 256)
    tk = block_kv if block_kv is not None else _pick_tile(T, 256)
    assert T % tq == 0 and T % tk == 0, "T must be divisible by the tiles"
    nq, nk = T // tq, T // tk

    def kv_index_map(b, i, j):
        # Clamp the kv block index to the last block needed for this query
        # tile.  Skipped (above-diagonal) steps then repeat the previous block
        # index, so Pallas does not re-issue their K/V DMAs at all.
        last_needed = ((i + 1) * tq - 1) // tk
        return (b, jnp.minimum(j, last_needed), 0)

    flash = pl.pallas_call(
        functools.partial(_flash_attn_kernel, block_q=tq, block_kv=tk),
        out_shape=jax.ShapeDtypeStruct((B, T, H), x.dtype),
        grid_spec=pltpu.PrefetchScalarGridSpec(
            num_scalar_prefetch=0,
            grid=(B, nq, nk),
            in_specs=[
                pl.BlockSpec((1, tq, H), lambda b, i, j: (b, i, 0)),
                pl.BlockSpec((1, tk, H), kv_index_map),
                pl.BlockSpec((1, tk, H), kv_index_map),
            ],
            out_specs=pl.BlockSpec((1, tq, H), lambda b, i, j: (b, i, 0)),
            scratch_shapes=[
                pltpu.VMEM((tq, 1), jnp.float32),   # running max m
                pltpu.VMEM((tq, 1), jnp.float32),   # running denom l
                pltpu.VMEM((tq, H), jnp.float32),   # output accumulator
            ],
        ),
        compiler_params=pltpu.CompilerParams(
            dimension_semantics=("parallel", "parallel", "arbitrary"),
            vmem_limit_bytes=vmem_limit_bytes),
    )
    return flash(q, k, v)


def head_reference(x, wk, wq, wv):
    """Plain-JAX reference mirroring the PyTorch forward."""
    K = x @ wk
    Q = x @ wq
    V = x @ wv
    d = K.shape[-1]
    A = (Q @ jnp.swapaxes(K, -1, -2)) * (d ** -0.5)
    T = x.shape[1]
    mask = jnp.tril(jnp.ones((T, T)))
    A = jnp.where(mask == 0, -jnp.inf, A)
    A = jax.nn.softmax(A, axis=-1)
    return A @ V


if __name__ == "__main__":
    # Small shapes consistent with the module (block size n >= T).
    B, T, C, H = 2, 64, 32, 16

    key = jax.random.PRNGKey(0)
    kx, kk, kq, kv = jax.random.split(key, 4)

    x = jax.random.normal(kx, (B, T, C), dtype=jnp.float32)
    bound = 1.0 / (C ** 0.5)
    wk = jax.random.uniform(kk, (C, H), minval=-bound, maxval=bound,
                            dtype=jnp.float32)
    wq = jax.random.uniform(kq, (C, H), minval=-bound, maxval=bound,
                            dtype=jnp.float32)
    wv = jax.random.uniform(kv, (C, H), minval=-bound, maxval=bound,
                            dtype=jnp.float32)

    y_ref = head_reference(x, wk, wq, wv)

    # f32 MXU path; tiles of 32 exercise causal block/DMA skipping on the grid.
    # (Tolerance accounts for the EUP approximate reciprocal, ~2^-12 rel.)
    y = head_forward(x, wk, wq, wv, block_q=32, block_kv=32)
    jax.block_until_ready(y)
    assert jnp.allclose(y, y_ref, atol=5e-3, rtol=5e-3), "f32 mismatch"

    # Default tiling (single kv block per query tile here).
    y_def = head_forward(x, wk, wq, wv)
    jax.block_until_ready(y_def)
    assert jnp.allclose(y_def, y_ref, atol=5e-3, rtol=5e-3), "default mismatch"

    # bf16 MXU operands with f32 accumulation (flash-attention precision).
    y_bf16 = head_forward(x, wk, wq, wv, block_q=32, block_kv=32,
                          compute_dtype=jnp.bfloat16)
    jax.block_until_ready(y_bf16)
    assert jnp.allclose(y_bf16, y_ref, atol=3e-2, rtol=3e-2), "bf16 mismatch"

    print("KERNEL_OK")
</pallas_src>

<mosaic_0001>
module attributes {stable_mosaic.version = 11 : i64} {
  func.func @_qkv_proj_kernel(%arg0: i32, %arg1: i32, %arg2: memref<1x64x32xf32, #tpu.memory_space<vmem>>, %arg3: memref<32x48xf32, #tpu.memory_space<vmem>>, %arg4: memref<1x64x16xf32, #tpu.memory_space<vmem>>, %arg5: memref<1x64x16xf32, #tpu.memory_space<vmem>>, %arg6: memref<1x64x16xf32, #tpu.memory_space<vmem>>) attributes {dimension_semantics = [#tpu.dimension_semantics<parallel>, #tpu.dimension_semantics<parallel>], iteration_bounds = array<i64: 2, 1>, scalar_prefetch = 0 : i64, scratch_operands = 0 : i64, tpu.core_type = #tpu.core_type<tc>, window_params = [{transform_indices = @transform_0, window_bounds = array<i64: 1, 64, 32>}, {pipeline_mode = #tpu.pipeline_mode<synchronous>, transform_indices = @transform_1, window_bounds = array<i64: 32, 48>}, {transform_indices = @transform_2, window_bounds = array<i64: 1, 64, 16>}, {transform_indices = @transform_3, window_bounds = array<i64: 1, 64, 16>}, {transform_indices = @transform_4, window_bounds = array<i64: 1, 64, 16>}]} {
    %c0 = arith.constant 0 : index
    %c0_0 = arith.constant 0 : index
    %c0_1 = arith.constant 0 : index
    %0 = vector.load %arg2[%c0, %c0_0, %c0_1] : memref<1x64x32xf32, #tpu.memory_space<vmem>>, vector<1x64x32xf32>
    %1 = vector.shape_cast %0 : vector<1x64x32xf32> to vector<64x32xf32>
    %c0_2 = arith.constant 0 : index
    %c0_3 = arith.constant 0 : index
    %2 = vector.load %arg3[%c0_2, %c0_3] : memref<32x48xf32, #tpu.memory_space<vmem>>, vector<32x48xf32>
    %cst = arith.constant dense<0.000000e+00> : vector<64x48xf32>
    %3 = tpu.matmul %1, %2, %cst {dimension_numbers = #tpu.dot_dimension_numbers<[1], [0], [0], [1], [0, 0, 1, 1], [], []>} : vector<64x32xf32>, vector<32x48xf32>, vector<64x48xf32> -> vector<64x48xf32>
    %4 = vector.extract_strided_slice %3 {offsets = [0, 0], sizes = [64, 16], strides = [1, 1]} : vector<64x48xf32> to vector<64x16xf32>
    %cst_4 = arith.constant 2.500000e-01 : f32
    %5 = vector.broadcast %cst_4 : f32 to vector<64x16xf32>
    %6 = arith.mulf %4, %5 : vector<64x16xf32>
    %c0_5 = arith.constant 0 : index
    %c0_6 = arith.constant 0 : index
    %c0_7 = arith.constant 0 : index
    %7 = vector.load %arg4[%c0_5, %c0_6, %c0_7] : memref<1x64x16xf32, #tpu.memory_space<vmem>>, vector<1x64x16xf32>
    %8 = vector.shape_cast %7 : vector<1x64x16xf32> to vector<64x16xf32>
    %9 = vector.shape_cast %6 : vector<64x16xf32> to vector<1x64x16xf32>
    tpu.vector_store %arg4[%c0_5, %c0_6, %c0_7], %9 {strides = array<i32>} : memref<1x64x16xf32, #tpu.memory_space<vmem>>, vector<1x64x16xf32>,
    %10 = vector.extract_strided_slice %3 {offsets = [0, 16], sizes = [64, 16], strides = [1, 1]} : vector<64x48xf32> to vector<64x16xf32>
    %c0_8 = arith.constant 0 : index
    %c0_9 = arith.constant 0 : index
    %c0_10 = arith.constant 0 : index
    %11 = vector.load %arg5[%c0_8, %c0_9, %c0_10] : memref<1x64x16xf32, #tpu.memory_space<vmem>>, vector<1x64x16xf32>
    %12 = vector.shape_cast %11 : vector<1x64x16xf32> to vector<64x16xf32>
    %13 = vector.shape_cast %10 : vector<64x16xf32> to vector<1x64x16xf32>
    tpu.vector_store %arg5[%c0_8, %c0_9, %c0_10], %13 {strides = array<i32>} : memref<1x64x16xf32, #tpu.memory_space<vmem>>, vector<1x64x16xf32>,
    %14 = vector.extract_strided_slice %3 {offsets = [0, 32], sizes = [64, 16], strides = [1, 1]} : vector<64x48xf32> to vector<64x16xf32>
    %c0_11 = arith.constant 0 : index
    %c0_12 = arith.constant 0 : index
    %c0_13 = arith.constant 0 : index
    %15 = vector.load %arg6[%c0_11, %c0_12, %c0_13] : memref<1x64x16xf32, #tpu.memory_space<vmem>>, vector<1x64x16xf32>
    %16 = vector.shape_cast %15 : vector<1x64x16xf32> to vector<64x16xf32>
    %17 = vector.shape_cast %14 : vector<64x16xf32> to vector<1x64x16xf32>
    tpu.vector_store %arg6[%c0_11, %c0_12, %c0_13], %17 {strides = array<i32>} : memref<1x64x16xf32, #tpu.memory_space<vmem>>, vector<1x64x16xf32>,
    return
  }
  func.func @transform_0(%arg0: i32, %arg1: i32) -> (i32, i32, i32) {
    %c0_i32 = arith.constant 0 : i32
    %c0_i32_0 = arith.constant 0 : i32
    return %arg0, %arg1, %c0_i32 : i32, i32, i32
  }
  func.func @transform_1(%arg0: i32, %arg1: i32) -> (i32, i32) {
    %c0_i32 = arith.constant 0 : i32
    %c0_i32_0 = arith.constant 0 : i32
    %c0_i32_1 = arith.constant 0 : i32
    return %c0_i32, %c0_i32_0 : i32, i32
  }
  func.func @transform_2(%arg0: i32, %arg1: i32) -> (i32, i32, i32) {
    %c0_i32 = arith.constant 0 : i32
    %c0_i32_0 = arith.constant 0 : i32
    return %arg0, %arg1, %c0_i32 : i32, i32, i32
  }
  func.func @transform_3(%arg0: i32, %arg1: i32) -> (i32, i32, i32) {
    %c0_i32 = arith.constant 0 : i32
    %c0_i32_0 = arith.constant 0 : i32
    return %arg0, %arg1, %c0_i32 : i32, i32, i32
  }
  func.func @transform_4(%arg0: i32, %arg1: i32) -> (i32, i32, i32) {
    %c0_i32 = arith.constant 0 : i32
    %c0_i32_0 = arith.constant 0 : i32
    return %arg0, %arg1, %c0_i32 : i32, i32, i32
  }
}

</mosaic_0001>

<bundles_post_ra>
// kernel: tpu_custom_call.1
= control target key start
LH: loop header
LB: loop body
LE: loop exit
PB: predicated region body
PF: predicated region fallthrough
CT: control target
= control target key end

     0   :  { %s754_s15 = smov 0   ;;  %s756_s16 = smov 0   ;;  %s879_s0 = inlined_call_operand.vmem [shape: f32[2,64,32], index: 0, kind: input, shape index: {}]   ;;  %s880_s1 = inlined_call_operand.vmem [shape: f32[32,48], index: 1, kind: input, shape index: {}]   ;;  %s881_s2 = inlined_call_operand.vmem [shape: f32[2,64,16], index: 2, kind: output, shape index: {0}]   ;;  %s882_s3 = inlined_call_operand.vmem [shape: f32[2,64,16], index: 3, kind: output, shape index: {1}]   ;;  %s883_s4 = inlined_call_operand.vmem [shape: f32[2,64,16], index: 4, kind: output, shape index: {2}]  }
   0x1   :  { %s758_s17 = smov 0  }
   0x2 LB: > { %s27_s18 = sadd.s32 1, %s721_s16  ;;  %p642_p0 = scmp.ge.s32.totalorder %s725_s17, 1  ;;  %s725_s17 = sphi %s758_s17, %s15_s17   ;;  %s721_s16 = sphi %s756_s16, %s885_s16   ;;  %s717_s15 = sphi %s754_s15, %s884_s15  }
   0x3   : > { %p29_p1 = scmp.ge.s32.totalorder %s27_s18, 2  ;;  %p192_p2 = scmp.lt.s32.totalorder %s725_s17, 3 }
   0x5   : > { %s887_s18 = smov (%p29_p1, %s27_s18), 0  ;;  %p193_p3 = pnand %p642_p0, %p192_p2 }
   0x6   : > { %p245_p4 = scmp.lt.s32.totalorder (!%p193_p3), %s717_s15, 1  ;;  %s727_s8 = smov (!%p193_p3), 112  }
   0x7   : > { %196 = sbr.rel (%p193_p3) target bundleno = 303 (0x12f), region = 28  ;;  %s728_s9 = smov (!%p193_p3), 96  }
   0xc   : > { %v295_v0 = vld [vmem:[%s880_s1 + $0x18] sm:$0xff]  ;;  %v294_v1 = vld [vmem:[%s880_s1 + $0x10] sm:$0xff]  ;;  %v293_v2 = vld [vmem:[%s880_s1 + $0x8] sm:$0xff]  ;;  %s889_s15 = smov (!%p245_p4, %s717_s15), 1  ;;  %vm296_vm0 = vcmask 261120   ;;  %vm370_vm1 = vcmask 130048  }
   0xd   : > { %333 = vmatpush.msra.mxu0 %v295_v0  ;;  %665 = vmatpush.msra.mxu1 %v295_v0  ;;  %v292_v3 = vld [vmem:[%s880_s1] sm:$0xff]  ;;  %s784_s27 = sshll.u32 %s889_s15, 6 }
   0xe   : > { %666 = vmatpush.msra.mxu2 %v295_v0  ;;  %667 = vmatpush.msra.mxu3 %v295_v0  ;;  %s252_s30 = scalar_lea.vmem %s879_s0, %s784_s27  ;;  %s802_s7 = scalar_lea.vmem %s881_s2, %s784_s27 }
   0xf   : > { %334 = vmatpush.msra.mxu0 %v294_v1  ;;  %668 = vmatpush.msra.mxu1 %v294_v1  ;;  %v284_v4 = vld [vmem:[%s252_s30] sm:$0xff]  ;;  %v286_v5 = vld [vmem:[%s252_s30 + $0x10] sm:$0xff]  ;;  %v287_v8 = vld [vmem:[%s252_s30 + $0x18] sm:$0xff]  ;;  %s840_s12 = scalar_lea.vmem %s883_s4, %s784_s27  ;;  %s272_s15 = scalar_lea.vmem %s882_s3, %s784_s27 }
  0x10   : > { %669 = vmatpush.msra.mxu2 %v294_v1  ;;  %670 = vmatpush.msra.mxu3 %v294_v1  ;;  %v288_v6 = vld [vmem:[%s252_s30 + $0x20] sm:$0xff]  ;;  %v290_v7 = vld [vmem:[%s252_s30 + $0x30] sm:$0xff]  ;;  %v285_v9 = vld [vmem:[%s252_s30 + $0x8] sm:$0xff] }
  0x11   : > { %335 = vmatpush.msra.mxu0 %v293_v2  ;;  %671 = vmatpush.msra.mxu1 %v293_v2  ;;  %v289_v10 = vld [vmem:[%s252_s30 + $0x28] sm:$0xff]  ;;  %v291_v11 = vld [vmem:[%s252_s30 + $0x38] sm:$0xff] }
  0x12   : > { %672 = vmatpush.msra.mxu2 %v293_v2  ;;  %673 = vmatpush.msra.mxu3 %v293_v2 }
  0x13   : > { %336 = vmatpush.msra.mxu0 %v292_v3  ;;  %674 = vmatpush.msra.mxu1 %v292_v3 }
  0x14   : > { %651 = vmatmul.msk.f32.vlgmr.msra.gmra.mxu0 %vm296_vm0, %v284_v4  ;;  %653 = vmatmul.msk.f32.vlgmr.msra.gmra.mxu1 %vm296_vm0, %v286_v5 }
  0x15   : > { %675 = vmatpush.msra.mxu2 %v292_v3  ;;  %676 = vmatpush.msra.mxu3 %v292_v3 }
  0x16   : > { %655 = vmatmul.msk.f32.vlgmr.msra.gmra.mxu2 %vm296_vm0, %v288_v6  ;;  %657 = vmatmul.msk.f32.vlgmr.msra.gmra.mxu3 %vm296_vm0, %v290_v7 }
  0x1c   : > { %654 = vmatmul.msk.f32.gmra.mxu1 %vm296_vm0, %v287_v8  ;;  %652 = vmatmul.msk.f32.gmra.mxu0 %vm296_vm0, %v285_v9 }
  0x1e   : > { %656 = vmatmul.msk.f32.gmra.mxu2 %vm296_vm0, %v289_v10  ;;  %658 = vmatmul.msk.f32.gmra.mxu3 %vm296_vm0, %v291_v11 }
  0x91   : > { %v338_v12 = vpop.f32.mrf.mxu0  ;;  %v344_v13 = vpop.f32.mrf.mxu1 }
  0x92   : > { %v362_v14 = vmul.f32 0.25, %v338_v12  ;;  %v364_v15 = vmul.f32 0.25, %v344_v13  ;;  %391 = vrot.lane.b32.xlu1 %v344_v13, %s727_s8  ;;  %419 = vrot.lane.b32.xlu2 %v338_v12, %s728_s9 }
  0x93   : > { %387 = vrot.lane.b32.xlu0 %v338_v12, %s727_s8 }
  0x94   : > { %371 = vst.msk [vmem:[%s802_s7] sm:$0xff] %vm370_vm1, %v362_v14 }
  0x95   : > { %373 = vst.msk [vmem:[%s802_s7 + $0x10] sm:$0xff] %vm370_vm1, %v364_v15 }
  0x99   : > { %v350_v16 = vpop.f32.mrf.mxu2  ;;  %v356_v17 = vpop.f32.mrf.mxu3 }
  0x9a   : > { %v366_v18 = vmul.f32 0.25, %v350_v16  ;;  %v368_v19 = vmul.f32 0.25, %v356_v17  ;;  %423 = vrot.lane.b32.xlu1 %v344_v13, %s728_s9  ;;  %395 = vrot.lane.b32.xlu2 %v350_v16, %s727_s8  ;;  %v347_v20 = vpop.f32.mrf.mxu1  ;;  %v341_v21 = vpop.f32.mrf.mxu0 }
  0x9b   : > { %399 = vrot.lane.b32.xlu0 %v356_v17, %s727_s8  ;;  %v365_v22 = vmul.f32 0.25, %v347_v20  ;;  %v363_v23 = vmul.f32 0.25, %v341_v21 }
  0x9c   : > { %375 = vst.msk [vmem:[%s802_s7 + $0x20] sm:$0xff] %vm370_vm1, %v366_v18 }
  0x9d   : > { %377 = vst.msk [vmem:[%s802_s7 + $0x30] sm:$0xff] %vm370_vm1, %v368_v19 }
  0x9e   : > { %374 = vst.msk [vmem:[%s802_s7 + $0x18] sm:$0xff] %vm370_vm1, %v365_v22 }
  0x9f   : > { %372 = vst.msk [vmem:[%s802_s7 + $0x8] sm:$0xff] %vm370_vm1, %v363_v23 }
  0xa1   : > { %v353_v24 = vpop.f32.mrf.mxu2  ;;  %v359_v25 = vpop.f32.mrf.mxu3 }
  0xa2   : > { %425 = vrot.lane.b32.xlu2 %v347_v20, %s728_s9  ;;  %v367_v26 = vmul.f32 0.25, %v353_v24  ;;  %393 = vrot.lane.b32.xlu1 %v347_v20, %s727_s8  ;;  %v369_v27 = vmul.f32 0.25, %v359_v25 }
  0xa3   : > { %427 = vrot.lane.b32.xlu0 %v350_v16, %s728_s9 }
  0xa4   : > { %376 = vst.msk [vmem:[%s802_s7 + $0x28] sm:$0xff] %vm370_vm1, %v367_v26 }
  0xa5   : > { %378 = vst.msk [vmem:[%s802_s7 + $0x38] sm:$0xff] %vm370_vm1, %v369_v27 }
  0xaa   : > { %397 = vrot.lane.b32.xlu2 %v353_v24, %s727_s8  ;;  %401 = vrot.lane.b32.xlu1 %v359_v25, %s727_s8 }
  0xab   : > { %389 = vrot.lane.b32.xlu0 %v341_v21, %s727_s8 }
  0xb2   : > { %431 = vrot.lane.b32.xlu2 %v356_v17, %s728_s9  ;;  %429 = vrot.lane.b32.xlu1 %v353_v24, %s728_s9 }
  0xb3   : > { %421 = vrot.lane.b32.xlu0 %v341_v21, %s728_s9 }
  0xbb   : > { %433 = vrot.lane.b32.xlu0 %v359_v25, %s728_s9 }
  0xec   : > { %v420_v28 = vpop.permute.xlu2 %419 }
  0xed   : > { %443 = vst.msk [vmem:[%s840_s12] sm:$0xff] %vm370_vm1, %v420_v28 }
  0xf4   : > { %v396_v29 = vpop.permute.xlu2 %395 }
  0xf5   : > { %415 = vst.msk [vmem:[%s272_s15 + $0x20] sm:$0xff] %vm370_vm1, %v396_v29 }
  0xfc   : > { %v426_v30 = vpop.permute.xlu2 %425 }
  0xfd   : > { %446 = vst.msk [vmem:[%s840_s12 + $0x18] sm:$0xff] %vm370_vm1, %v426_v30 }
 0x104   : > { %v392_v31 = vpop.permute.xlu1 %391  ;;  %v398_v32 = vpop.permute.xlu2 %397 }
 0x105   : > { %413 = vst.msk [vmem:[%s272_s15 + $0x10] sm:$0xff] %vm370_vm1, %v392_v31  ;;  %v388_v33 = vpop.permute.xlu0 %387 }
 0x106   : > { %416 = vst.msk [vmem:[%s272_s15 + $0x28] sm:$0xff] %vm370_vm1, %v398_v32 }
 0x107   : > { %411 = vst.msk [vmem:[%s272_s15] sm:$0xff] %vm370_vm1, %v388_v33 }
 0x10c   : > { %v424_v34 = vpop.permute.xlu1 %423  ;;  %v432_v35 = vpop.permute.xlu2 %431 }
 0x10d   : > { %445 = vst.msk [vmem:[%s840_s12 + $0x10] sm:$0xff] %vm370_vm1, %v424_v34  ;;  %v400_v36 = vpop.permute.xlu0 %399 }
 0x10e   : > { %449 = vst.msk [vmem:[%s840_s12 + $0x30] sm:$0xff] %vm370_vm1, %v432_v35 }
 0x10f   : > { %417 = vst.msk [vmem:[%s272_s15 + $0x30] sm:$0xff] %vm370_vm1, %v400_v36 }
 0x114   : > { %v394_v37 = vpop.permute.xlu1 %393 }
 0x115   : > { %v428_v38 = vpop.permute.xlu0 %427  ;;  %414 = vst.msk [vmem:[%s272_s15 + $0x18] sm:$0xff] %vm370_vm1, %v394_v37 }
 0x116   : > { %447 = vst.msk [vmem:[%s840_s12 + $0x20] sm:$0xff] %vm370_vm1, %v428_v38 }
 0x11c   : > { %v402_v39 = vpop.permute.xlu1 %401 }
 0x11d   : > { %v390_v40 = vpop.permute.xlu0 %389  ;;  %418 = vst.msk [vmem:[%s272_s15 + $0x38] sm:$0xff] %vm370_vm1, %v402_v39 }
 0x11e   : > { %412 = vst.msk [vmem:[%s272_s15 + $0x8] sm:$0xff] %vm370_vm1, %v390_v40 }
 0x124   : > { %v430_v41 = vpop.permute.xlu1 %429 }
 0x125   : > { %v422_v42 = vpop.permute.xlu0 %421  ;;  %448 = vst.msk [vmem:[%s840_s12 + $0x28] sm:$0xff] %vm370_vm1, %v430_v41 }
 0x126   : > { %444 = vst.msk [vmem:[%s840_s12 + $0x8] sm:$0xff] %vm370_vm1, %v422_v42 }
 0x12d   : > { %v434_v43 = vpop.permute.xlu0 %433 }
 0x12e   : > { %450 = vst.msk [vmem:[%s840_s12 + $0x38] sm:$0xff] %vm370_vm1, %v434_v43 }
 0x12f PF: > { %s15_s17 = sadd.s32 1, %s725_s17   ;;  %s884_s15 = smov %s721_s16 }
 0x130   : > { %p12_p5 = scmp.ge.s32.totalorder %s15_s17, 4   ;;  %s885_s16 = smov %s887_s18 }
 0x132   :  { %14 = sbr.rel (!%p12_p5) target bundleno = 2 (0x2), region = 82 }

</bundles_post_ra>
